<compile_context>
chip_gen: v7x
topology: tpu7x:2x2x1
jax: 0.10.0
libtpu: 0.0.40
codegen_flags: <defaults>
</compile_context>

<pallas_src>
import jax
import jax.numpy as jnp
from jax.experimental import pallas as pl
from jax.experimental.pallas import tpu as pltpu

input_size = 4
hidden_size = 10
num_classes = 3

LANES = 128     # every hidden/output feature dim is zero-padded to one full lane width
IN_PAD = 8      # input features padded 4 -> 8 (one f32 sublane), NOT to 128
N_LAYERS = 6    # fc1, rb1.fc1, rb1.fc2, rb2.fc1, rb2.fc2, fc2
BIAS_ROWS = 8   # 6 bias rows padded up to a full f32 sublane tile
MAX_TB = 1024   # per-step VMEM stays ~1 MiB; amortizes the ~0.35us per-grid-step cost
TB_ALIGN = 16   # bf16 output sublane packing


def _round_up(n, m):
    return (n + m - 1) // m * m


def _choose_tile(B):
    """Batch tile: >=2 grid steps when possible (both TCs on v7x), <= MAX_TB rows,
    16-row aligned, sized to keep batch padding small."""
    if B <= TB_ALIGN:
        return TB_ALIGN
    n_tiles = max(2, pl.cdiv(B, MAX_TB))
    return min(MAX_TB, _round_up(pl.cdiv(B, n_tiles), TB_ALIGN))


def simple_resnet_kernel(x_ref, w0_ref, w_ref, b_ref, o_ref):
    """x_ref:  (TB, 8)        f32   input rows (features zero-padded 4 -> 8)
       w0_ref: (8, 128)       bf16  fc1 weight, (in, out) layout, zero-padded
       w_ref:  (5, 128, 128)  bf16  remaining weights, (in, out) layout, zero-padded
       b_ref:  (8, 128)       f32   per-layer bias rows, zero-padded
       o_ref:  (TB, 128)      bf16  lane-dense logits (real ones in lanes [0, 3))
    Zero padding is mathematically inert: relu(0)=0, bias pad is 0, residual adds 0.
    """

    def lin(h, k):
        # bf16 MXU operands, f32 accumulation; bias / relu / residual stay in f32.
        return (jnp.dot(h.astype(jnp.bfloat16), w_ref[k - 1],
                        preferred_element_type=jnp.float32)
                + b_ref[k:k + 1, :])

    # trunk: relu(fc1(x)) -- narrow K=8 contraction against the dedicated fc1 slab
    h = jnp.maximum(
        jnp.dot(x_ref[...].astype(jnp.bfloat16), w0_ref[...],
                preferred_element_type=jnp.float32) + b_ref[0:1, :],
        0.0)

    # residual block 1
    res = h
    t = jnp.maximum(lin(h, 1), 0.0)
    h = jnp.maximum(lin(t, 2) + res, 0.0)

    # residual block 2
    res = h
    t = jnp.maximum(lin(h, 3), 0.0)
    h = jnp.maximum(lin(t, 4) + res, 0.0)

    # head: fc2 -> lane-dense bf16 store
    o_ref[...] = lin(h, 5).astype(o_ref.dtype)


def pack_params(params):
    """Pack the six Linear layers into bf16 weight slabs + one f32 bias slab.
    Call ONCE at init (hoisted out of the per-inference path)."""
    names = (
        "fc1",
        "residual_block1.fc1", "residual_block1.fc2",
        "residual_block2.fc1", "residual_block2.fc2",
        "fc2",
    )
    w0 = jnp.zeros((IN_PAD, LANES), jnp.float32)
    w0 = w0.at[:input_size, :hidden_size].set(
        params["fc1.weight"].T.astype(jnp.float32))
    w_slab = jnp.zeros((N_LAYERS - 1, LANES, LANES), jnp.float32)
    b_slab = jnp.zeros((BIAS_ROWS, LANES), jnp.float32)
    b_slab = b_slab.at[0, :hidden_size].set(params["fc1.bias"].astype(jnp.float32))
    for k, name in enumerate(names[1:], start=1):
        w = params[name + ".weight"]          # (out, in) PyTorch convention
        b = params[name + ".bias"]            # (out,)
        out_f, in_f = w.shape
        w_slab = w_slab.at[k - 1, :in_f, :out_f].set(w.T.astype(jnp.float32))
        b_slab = b_slab.at[k, :out_f].set(b.astype(jnp.float32))
    return w0.astype(jnp.bfloat16), w_slab.astype(jnp.bfloat16), b_slab


@jax.jit
def simple_resnet_pallas(x, w0_slab, w_slab, b_slab):
    """x: (B, 4) float; slabs from pack_params. Returns (B, num_classes) f32 logits."""
    B = x.shape[0]
    TB = _choose_tile(B)
    B_pad = _round_up(B, TB)

    x_pad = jnp.pad(x.astype(jnp.float32),
                    ((0, B_pad - B), (0, IN_PAD - x.shape[1])))

    grid = (B_pad // TB,)

    cost = pl.CostEstimate(
        flops=2 * B_pad * LANES * (IN_PAD + (N_LAYERS - 1) * LANES),
        transcendentals=0,
        bytes_accessed=(4 * x_pad.size + 2 * w0_slab.size + 2 * w_slab.size
                        + 4 * b_slab.size + 2 * B_pad * LANES),
    )

    out = pl.pallas_call(
        simple_resnet_kernel,
        out_shape=jax.ShapeDtypeStruct((B_pad, LANES), jnp.bfloat16),
        grid=grid,
        in_specs=[
            # batch tile marches over the grid (narrow 8-lane input slab)
            pl.BlockSpec((TB, IN_PAD), lambda i: (i, 0)),
            # weights + biases stay VMEM-resident across all batch tiles
            pl.BlockSpec((IN_PAD, LANES), lambda i: (0, 0)),
            pl.BlockSpec((N_LAYERS - 1, LANES, LANES), lambda i: (0, 0, 0)),
            pl.BlockSpec((BIAS_ROWS, LANES), lambda i: (0, 0)),
        ],
        out_specs=pl.BlockSpec((TB, LANES), lambda i: (i, 0)),
        compiler_params=pltpu.CompilerParams(
            dimension_semantics=("parallel",)),
        cost_estimate=cost,
    )(x_pad, w0_slab, w_slab, b_slab)

    # Strip batch padding / padded lanes; return f32 logits.
    return out[:B, :num_classes].astype(jnp.float32)


def simple_resnet_ref(x, params):
    """Pure-JAX f32 reference reproducing the PyTorch forward exactly."""
    def lin(h, name):
        return h @ params[name + ".weight"].T + params[name + ".bias"]

    h = jax.nn.relu(lin(x, "fc1"))
    for blk in ("residual_block1", "residual_block2"):
        res = h
        t = jax.nn.relu(lin(h, blk + ".fc1"))
        t = lin(t, blk + ".fc2")
        h = jax.nn.relu(t + res)
    return lin(h, "fc2")


def init_params(key):
    """Deterministic init matching nn.Linear shapes (weight: (out, in), bias: (out,))."""
    shapes = {
        "fc1": (hidden_size, input_size),
        "residual_block1.fc1": (hidden_size, hidden_size),
        "residual_block1.fc2": (hidden_size, hidden_size),
        "residual_block2.fc1": (hidden_size, hidden_size),
        "residual_block2.fc2": (hidden_size, hidden_size),
        "fc2": (num_classes, hidden_size),
    }
    params = {}
    for name, (out_f, in_f) in shapes.items():
        key, kw, kb = jax.random.split(key, 3)
        bound = 1.0 / jnp.sqrt(in_f)
        params[name + ".weight"] = jax.random.uniform(
            kw, (out_f, in_f), jnp.float32, -bound, bound)
        params[name + ".bias"] = jax.random.uniform(
            kb, (out_f,), jnp.float32, -bound, bound)
    return params


if __name__ == "__main__":
    key = jax.random.PRNGKey(0)
    key, kx1, kx2 = jax.random.split(key, 3)
    params = init_params(key)

    # Pack once (hoisted out of the inference path).
    w0_slab, w_slab, b_slab = pack_params(params)

    # Small batch: single grid step (block == full array).
    x1 = jax.random.normal(kx1, (8, input_size), jnp.float32)
    out1 = jax.block_until_ready(simple_resnet_pallas(x1, w0_slab, w_slab, b_slab))
    ref1 = simple_resnet_ref(x1, params)
    assert out1.shape == (8, num_classes)
    assert jnp.allclose(out1, ref1, atol=5e-2, rtol=5e-2), "mismatch vs reference (B=8)"

    # Larger batch: exercises the multi-tile (grid > 1) pipelined path.
    x2 = jax.random.normal(kx2, (40, input_size), jnp.float32)
    out2 = jax.block_until_ready(simple_resnet_pallas(x2, w0_slab, w_slab, b_slab))
    ref2 = simple_resnet_ref(x2, params)
    assert out2.shape == (40, num_classes)
    assert jnp.allclose(out2, ref2, atol=5e-2, rtol=5e-2), "mismatch vs reference (B=40)"

    print("KERNEL_OK")
</pallas_src>

<mosaic_0001>
module attributes {stable_mosaic.version = 11 : i64} {
  func.func @simple_resnet_kernel(%arg0: i32, %arg1: memref<16x8xf32, #tpu.memory_space<vmem>>, %arg2: memref<8x128xbf16, #tpu.memory_space<vmem>>, %arg3: memref<5x128x128xbf16, #tpu.memory_space<vmem>>, %arg4: memref<8x128xf32, #tpu.memory_space<vmem>>, %arg5: memref<16x128xbf16, #tpu.memory_space<vmem>>) attributes {dimension_semantics = [#tpu.dimension_semantics<parallel>], iteration_bounds = array<i64: 1>, scalar_prefetch = 0 : i64, scratch_operands = 0 : i64, tpu.core_type = #tpu.core_type<tc>, window_params = [{transform_indices = @transform_0, window_bounds = array<i64: 16, 8>}, {pipeline_mode = #tpu.pipeline_mode<synchronous>, transform_indices = @transform_1, window_bounds = array<i64: 8, 128>}, {pipeline_mode = #tpu.pipeline_mode<synchronous>, transform_indices = @transform_2, window_bounds = array<i64: 5, 128, 128>}, {pipeline_mode = #tpu.pipeline_mode<synchronous>, transform_indices = @transform_3, window_bounds = array<i64: 8, 128>}, {transform_indices = @transform_4, window_bounds = array<i64: 16, 128>}]} {
    %c0 = arith.constant 0 : index
    %c0_0 = arith.constant 0 : index
    %0 = vector.load %arg1[%c0, %c0_0] : memref<16x8xf32, #tpu.memory_space<vmem>>, vector<16x8xf32>
    %1 = arith.truncf %0 : vector<16x8xf32> to vector<16x8xbf16>
    %c0_1 = arith.constant 0 : index
    %c0_2 = arith.constant 0 : index
    %2 = vector.load %arg2[%c0_1, %c0_2] : memref<8x128xbf16, #tpu.memory_space<vmem>>, vector<8x128xbf16>
    %cst = arith.constant dense<0.000000e+00> : vector<16x128xf32>
    %3 = tpu.matmul %1, %2, %cst {dimension_numbers = #tpu.dot_dimension_numbers<[1], [0], [0], [1], [0, 0, 1, 1], [], []>} : vector<16x8xbf16>, vector<8x128xbf16>, vector<16x128xf32> -> vector<16x128xf32>
    %c0_3 = arith.constant 0 : index
    %c0_4 = arith.constant 0 : index
    %4 = vector.load %arg4[%c0_3, %c0_4] : memref<8x128xf32, #tpu.memory_space<vmem>>, vector<1x128xf32>
    %5 = vector.broadcast %4 : vector<1x128xf32> to vector<16x128xf32>
    %6 = arith.addf %3, %5 : vector<16x128xf32>
    %cst_5 = arith.constant 0.000000e+00 : f32
    %7 = vector.broadcast %cst_5 : f32 to vector<16x128xf32>
    %8 = arith.maximumf %6, %7 : vector<16x128xf32>
    %9 = arith.truncf %8 : vector<16x128xf32> to vector<16x128xbf16>
    %c0_6 = arith.constant 0 : index
    %c0_7 = arith.constant 0 : index
    %c0_8 = arith.constant 0 : index
    %10 = vector.load %arg3[%c0_6, %c0_7, %c0_8] : memref<5x128x128xbf16, #tpu.memory_space<vmem>>, vector<1x128x128xbf16>
    %11 = vector.shape_cast %10 : vector<1x128x128xbf16> to vector<128x128xbf16>
    %cst_9 = arith.constant dense<0.000000e+00> : vector<16x128xf32>
    %12 = tpu.matmul %9, %11, %cst_9 {dimension_numbers = #tpu.dot_dimension_numbers<[1], [0], [0], [1], [0, 0, 1, 1], [], []>} : vector<16x128xbf16>, vector<128x128xbf16>, vector<16x128xf32> -> vector<16x128xf32>
    %c1 = arith.constant 1 : index
    %c0_10 = arith.constant 0 : index
    %13 = vector.load %arg4[%c1, %c0_10] : memref<8x128xf32, #tpu.memory_space<vmem>>, vector<1x128xf32>
    %14 = vector.broadcast %13 : vector<1x128xf32> to vector<16x128xf32>
    %15 = arith.addf %12, %14 : vector<16x128xf32>
    %cst_11 = arith.constant 0.000000e+00 : f32
    %16 = vector.broadcast %cst_11 : f32 to vector<16x128xf32>
    %17 = arith.maximumf %15, %16 : vector<16x128xf32>
    %18 = arith.truncf %17 : vector<16x128xf32> to vector<16x128xbf16>
    %c1_12 = arith.constant 1 : index
    %c0_13 = arith.constant 0 : index
    %c0_14 = arith.constant 0 : index
    %19 = vector.load %arg3[%c1_12, %c0_13, %c0_14] : memref<5x128x128xbf16, #tpu.memory_space<vmem>>, vector<1x128x128xbf16>
    %20 = vector.shape_cast %19 : vector<1x128x128xbf16> to vector<128x128xbf16>
    %cst_15 = arith.constant dense<0.000000e+00> : vector<16x128xf32>
    %21 = tpu.matmul %18, %20, %cst_15 {dimension_numbers = #tpu.dot_dimension_numbers<[1], [0], [0], [1], [0, 0, 1, 1], [], []>} : vector<16x128xbf16>, vector<128x128xbf16>, vector<16x128xf32> -> vector<16x128xf32>
    %c2 = arith.constant 2 : index
    %c0_16 = arith.constant 0 : index
    %22 = vector.load %arg4[%c2, %c0_16] : memref<8x128xf32, #tpu.memory_space<vmem>>, vector<1x128xf32>
    %23 = vector.broadcast %22 : vector<1x128xf32> to vector<16x128xf32>
    %24 = arith.addf %21, %23 : vector<16x128xf32>
    %25 = arith.addf %24, %8 : vector<16x128xf32>
    %cst_17 = arith.constant 0.000000e+00 : f32
    %26 = vector.broadcast %cst_17 : f32 to vector<16x128xf32>
    %27 = arith.maximumf %25, %26 : vector<16x128xf32>
    %28 = arith.truncf %27 : vector<16x128xf32> to vector<16x128xbf16>
    %c2_18 = arith.constant 2 : index
    %c0_19 = arith.constant 0 : index
    %c0_20 = arith.constant 0 : index
    %29 = vector.load %arg3[%c2_18, %c0_19, %c0_20] : memref<5x128x128xbf16, #tpu.memory_space<vmem>>, vector<1x128x128xbf16>
    %30 = vector.shape_cast %29 : vector<1x128x128xbf16> to vector<128x128xbf16>
    %cst_21 = arith.constant dense<0.000000e+00> : vector<16x128xf32>
    %31 = tpu.matmul %28, %30, %cst_21 {dimension_numbers = #tpu.dot_dimension_numbers<[1], [0], [0], [1], [0, 0, 1, 1], [], []>} : vector<16x128xbf16>, vector<128x128xbf16>, vector<16x128xf32> -> vector<16x128xf32>
    %c3 = arith.constant 3 : index
    %c0_22 = arith.constant 0 : index
    %32 = vector.load %arg4[%c3, %c0_22] : memref<8x128xf32, #tpu.memory_space<vmem>>, vector<1x128xf32>
    %33 = vector.broadcast %32 : vector<1x128xf32> to vector<16x128xf32>
    %34 = arith.addf %31, %33 : vector<16x128xf32>
    %cst_23 = arith.constant 0.000000e+00 : f32
    %35 = vector.broadcast %cst_23 : f32 to vector<16x128xf32>
    %36 = arith.maximumf %34, %35 : vector<16x128xf32>
    %37 = arith.truncf %36 : vector<16x128xf32> to vector<16x128xbf16>
    %c3_24 = arith.constant 3 : index
    %c0_25 = arith.constant 0 : index
    %c0_26 = arith.constant 0 : index
    %38 = vector.load %arg3[%c3_24, %c0_25, %c0_26] : memref<5x128x128xbf16, #tpu.memory_space<vmem>>, vector<1x128x128xbf16>
    %39 = vector.shape_cast %38 : vector<1x128x128xbf16> to vector<128x128xbf16>
    %cst_27 = arith.constant dense<0.000000e+00> : vector<16x128xf32>
    %40 = tpu.matmul %37, %39, %cst_27 {dimension_numbers = #tpu.dot_dimension_numbers<[1], [0], [0], [1], [0, 0, 1, 1], [], []>} : vector<16x128xbf16>, vector<128x128xbf16>, vector<16x128xf32> -> vector<16x128xf32>
    %c4 = arith.constant 4 : index
    %c0_28 = arith.constant 0 : index
    %41 = vector.load %arg4[%c4, %c0_28] : memref<8x128xf32, #tpu.memory_space<vmem>>, vector<1x128xf32>
    %42 = vector.broadcast %41 : vector<1x128xf32> to vector<16x128xf32>
    %43 = arith.addf %40, %42 : vector<16x128xf32>
    %44 = arith.addf %43, %27 : vector<16x128xf32>
    %cst_29 = arith.constant 0.000000e+00 : f32
    %45 = vector.broadcast %cst_29 : f32 to vector<16x128xf32>
    %46 = arith.maximumf %44, %45 : vector<16x128xf32>
    %47 = arith.truncf %46 : vector<16x128xf32> to vector<16x128xbf16>
    %c4_30 = arith.constant 4 : index
    %c0_31 = arith.constant 0 : index
    %c0_32 = arith.constant 0 : index
    %48 = vector.load %arg3[%c4_30, %c0_31, %c0_32] : memref<5x128x128xbf16, #tpu.memory_space<vmem>>, vector<1x128x128xbf16>
    %49 = vector.shape_cast %48 : vector<1x128x128xbf16> to vector<128x128xbf16>
    %cst_33 = arith.constant dense<0.000000e+00> : vector<16x128xf32>
    %50 = tpu.matmul %47, %49, %cst_33 {dimension_numbers = #tpu.dot_dimension_numbers<[1], [0], [0], [1], [0, 0, 1, 1], [], []>} : vector<16x128xbf16>, vector<128x128xbf16>, vector<16x128xf32> -> vector<16x128xf32>
    %c5 = arith.constant 5 : index
    %c0_34 = arith.constant 0 : index
    %51 = vector.load %arg4[%c5, %c0_34] : memref<8x128xf32, #tpu.memory_space<vmem>>, vector<1x128xf32>
    %52 = vector.broadcast %51 : vector<1x128xf32> to vector<16x128xf32>
    %53 = arith.addf %50, %52 : vector<16x128xf32>
    %54 = arith.truncf %53 : vector<16x128xf32> to vector<16x128xbf16>
    %c0_35 = arith.constant 0 : index
    %c0_36 = arith.constant 0 : index
    %55 = vector.load %arg5[%c0_35, %c0_36] : memref<16x128xbf16, #tpu.memory_space<vmem>>, vector<16x128xbf16>
    tpu.vector_store %arg5[%c0_35, %c0_36], %54 {strides = array<i32>} : memref<16x128xbf16, #tpu.memory_space<vmem>>, vector<16x128xbf16>,
    return
  }
  func.func @transform_0(%arg0: i32) -> (i32, i32) {
    %c0_i32 = arith.constant 0 : i32
    %c0_i32_0 = arith.constant 0 : i32
    return %arg0, %c0_i32 : i32, i32
  }
  func.func @transform_1(%arg0: i32) -> (i32, i32) {
    %c0_i32 = arith.constant 0 : i32
    %c0_i32_0 = arith.constant 0 : i32
    %c0_i32_1 = arith.constant 0 : i32
    return %c0_i32, %c0_i32_0 : i32, i32
  }
  func.func @transform_2(%arg0: i32) -> (i32, i32, i32) {
    %c0_i32 = arith.constant 0 : i32
    %c0_i32_0 = arith.constant 0 : i32
    %c0_i32_1 = arith.constant 0 : i32
    %c0_i32_2 = arith.constant 0 : i32
    return %c0_i32, %c0_i32_0, %c0_i32_1 : i32, i32, i32
  }
  func.func @transform_3(%arg0: i32) -> (i32, i32) {
    %c0_i32 = arith.constant 0 : i32
    %c0_i32_0 = arith.constant 0 : i32
    %c0_i32_1 = arith.constant 0 : i32
    return %c0_i32, %c0_i32_0 : i32, i32
  }
  func.func @transform_4(%arg0: i32) -> (i32, i32) {
    %c0_i32 = arith.constant 0 : i32
    %c0_i32_0 = arith.constant 0 : i32
    return %arg0, %c0_i32 : i32, i32
  }
}

</mosaic_0001>

<bundles_post_ra>
// kernel: simple_resnet_pallas.1
= control target key start
LH: loop header
LB: loop body
LE: loop exit
PB: predicated region body
PF: predicated region fallthrough
CT: control target
= control target key end

     0   :  { %9 = vsyncpa [#allocation3], 0  ;;  %s956_s15 = smov [#allocation2]   ;;  %s1095_s0 = inlined_call_operand.vmem [shape: f32[16,8], index: 0, kind: input, shape index: {}]   ;;  %s1096_s1 = inlined_call_operand.vmem [shape: bf16[8,128], index: 1, kind: input, shape index: {}]   ;;  %s1097_s2 = inlined_call_operand.hbm [shape: bf16[5,128,128], index: 2, kind: input, shape index: {}]   ;;  %s1098_s3 = inlined_call_operand.vmem [shape: f32[8,128], index: 3, kind: input, shape index: {}]   ;;  %s1099_s4 = inlined_call_operand.vmem [shape: bf16[16,128], index: 4, kind: output, shape index: {}]  }
   0x1   :  { %s19_s16 = sshll.u32 %s956_s15, 4  ;;  %s932_s19 = scalar_lea.hbm %s1097_s2, 5120  ;;  %s20_s16 = int_to_ptr.vmem [resolvable:$true] %s19_s16 }
   0x2   :  { %p933_p0 = scmp.ne.s32.totalorder %s1097_s2, %s932_s19  ;;  %p936_p1 = scmp.lt.u32.totalorder %s932_s19, %s1097_s2 }
   0x4   :  { %p938_p2 = pnand %p936_p1, %p933_p0 }
   0x6   :  { %941 = shalt.err (!%p938_p2)
}
   0x7   :  { %s942_s24 = scalar_lea.vmem %s20_s16, 5120  ;;  %p947_p4 = scmp.lt.s32.totalorder %s20_s16, %s20_s16 }
   0x8   :  { %p943_p3 = scmp.ne.s32.totalorder %s20_s16, %s942_s24  ;;  %p948_p5 = scmp.lt.s32.totalorder %s942_s24, %s942_s24 }
   0xa   :  { %p949_p6 = por %p948_p5, %p947_p4 }
   0xc   :  { %p950_p7 = pnand %p949_p6, %p943_p3 }
   0xe   :  { %953 = shalt.err (!%p950_p7)
}
   0xf   :  { %s957_s25 = smov 64   ;;  %s958_s26 = smov 4  }
  0x10   :  { %25 = dma.hbm_to_vmem [thread:$0]  %s1097_s2, 5120, %s20_s16, [#allocation3], %s957_s25, %s957_s25, %s958_s26  }
  0x11   :  { %954 = dma.done.wait [#allocation3], 5120  }
  0x12   :  { %955 = vsyncadd [#allocation3], 4294962176  ;;  %v959_v0 = vmov 0.0   ;;  %vm960_vm0 = vmmov 0   ;;  %vm45_vm1 = vcmask 1043456   ;;  %v32_v2 = vld [vmem:[%s1095_s0] sm:$0xff] }
  0x13   :  { %781 = vmatprep.subr.bf16.mxu0 %v959_v0  ;;  %783 = vmatprep.mubr.msk.bf16.mxu0 %vm960_vm0, %v959_v0  ;;  %v35_v1 = vld [vmem:[%s1096_s1] sm:$0xf]  ;;  %v33_v3 = vld [vmem:[%s1095_s0 + $0x8] sm:$0xff]  ;;  %vm41_vm2 = vcmask 64512   ;;  %v894_v8 = vld [vmem:[#allocation2 + $0x10] sm:$0xff]  }
  0x14   :  { %787 = vmatprep.subr.bf16.mxu1 %v959_v0  ;;  %803 = vmatprep.mubr.msk.bf16.mxu1 %vm960_vm0, %v959_v0  ;;  %v47_v4 = vsel %vm45_vm1, %v35_v1, 0  ;;  %v34_v5 = vpack.c.bf16 %v33_v3, %v32_v2  ;;  %v892_v6 = vld [vmem:[#allocation2] sm:$0xff]   ;;  %v893_v7 = vld [vmem:[#allocation2 + $0x8] sm:$0xff]   ;;  %v895_v9 = vld [vmem:[#allocation2 + $0x18] sm:$0xff]  }
  0x15   :  { %782 = vmatpush3.bf16.msra.mxu0 %v47_v4  ;;  %788 = vmatpush3.bf16.msra.mxu1 %v892_v6  ;;  %v896_v10 = vld [vmem:[#allocation2 + $0x20] sm:$0xff]   ;;  %v897_v11 = vld [vmem:[#allocation2 + $0x28] sm:$0xff]   ;;  %v898_v12 = vld [vmem:[#allocation2 + $0x30] sm:$0xff]  }
  0x16   :  { %807 = vmatprep.subr.bf16.mxu0 %v959_v0  ;;  %789 = vmatprep.subr.bf16.mxu1 %v959_v0  ;;  %v899_v13 = vld [vmem:[#allocation2 + $0x38] sm:$0xff]   ;;  %v900_v14 = vld [vmem:[#allocation2 + $0x40] sm:$0xff]   ;;  %v901_v15 = vld [vmem:[#allocation2 + $0x48] sm:$0xff]  }
  0x17   :  { %v902_v16 = vld [vmem:[#allocation2 + $0x50] sm:$0xff]   ;;  %v903_v17 = vld [vmem:[#allocation2 + $0x58] sm:$0xff]   ;;  %v904_v18 = vld [vmem:[#allocation2 + $0x60] sm:$0xff]  }
  0x18   :  { %784 = vmatmul.mubr.msk.bf16.vlgmr.msra.gmra.mrb[0].mxu0 %vm41_vm2, %v34_v5  ;;  %v905_v19 = vld [vmem:[#allocation2 + $0x68] sm:$0xff]   ;;  %v678_v20 = vld [vmem:[%s1098_s3] ss:$0 sm:$0xff]  ;;  %v906_v30 = vld [vmem:[#allocation2 + $0x70] sm:$0xff]  }
  0x19   :  { %823 = vmatprep.mubr.msk.bf16.mxu0 %vm960_vm0, %v959_v0  ;;  %790 = vmatpush3.bf16.msra.mxu1 %v893_v7  ;;  %v907_v31 = vld [vmem:[#allocation2 + $0x78] sm:$0xff]   ;;  %v908_v32 = vld [vmem:[#allocation2 + $0x80] sm:$0xff]   ;;  %v909_v33 = vld [vmem:[#allocation2 + $0x88] sm:$0xff]  }
  0x1a   :  { %791 = vmatprep.subr.bf16.mxu1 %v959_v0  ;;  %808 = vmatpush3.bf16.msra.mxu0 %v900_v14  ;;  %v910_v34 = vld [vmem:[#allocation2 + $0x90] sm:$0xff]   ;;  %v911_v35 = vld [vmem:[#allocation2 + $0x98] sm:$0xff]   ;;  %v912_v36 = vld [vmem:[#allocation2 + $0xa0] sm:$0xff]  }
  0x1b   :  { %809 = vmatprep.subr.bf16.mxu0 %v959_v0  ;;  %v680_v37 = vld [vmem:[%s1098_s3 + $0x1] ss:$0 sm:$0xff]  ;;  %v913_v47 = vld [vmem:[#allocation2 + $0xa8] sm:$0xff]   ;;  %v914_v48 = vld [vmem:[#allocation2 + $0xb0] sm:$0xff]  }
  0x1c   :  { %v915_v49 = vld [vmem:[#allocation2 + $0xb8] sm:$0xff]   ;;  %v916_v50 = vld [vmem:[#allocation2 + $0xc0] sm:$0xff]   ;;  %v917_v51 = vld [vmem:[#allocation2 + $0xc8] sm:$0xff]  }
  0x1d   :  { %792 = vmatpush3.bf16.msra.mxu1 %v894_v8  ;;  %v918_v52 = vld [vmem:[#allocation2 + $0xd0] sm:$0xff]   ;;  %v919_v53 = vld [vmem:[#allocation2 + $0xd8] sm:$0xff]   ;;  %v920_v54 = vld [vmem:[#allocation2 + $0xe0] sm:$0xff]  }
  0x1e   :  { %793 = vmatprep.subr.bf16.mxu1 %v959_v0  ;;  %810 = vmatpush3.bf16.msra.mxu0 %v901_v15  ;;  %v921_v55 = vld [vmem:[#allocation2 + $0xe8] sm:$0xff]   ;;  %v689_v56 = vld [vmem:[%s1098_s3 + $0x2] ss:$0 sm:$0xff]  ;;  %v922_v5 = vld [vmem:[#allocation2 + $0xf0] sm:$0xff]  }
  0x1f   :  { %811 = vmatprep.subr.bf16.mxu0 %v959_v0  ;;  %v923_v6 = vld [vmem:[#allocation2 + $0xf8] sm:$0xff]   ;;  %v924_v7 = vld [vmem:[#allocation2 + $0x100] sm:$0xff]   ;;  %v925_v8 = vld [vmem:[#allocation2 + $0x108] sm:$0xff]  }
  0x21   :  { %794 = vmatpush3.bf16.msra.mxu1 %v895_v9  ;;  %v926_v9 = vld [vmem:[#allocation2 + $0x110] sm:$0xff]  }
  0x22   :  { %795 = vmatprep.subr.bf16.mxu1 %v959_v0  ;;  %812 = vmatpush3.bf16.msra.mxu0 %v902_v16 }
  0x23   :  { %813 = vmatprep.subr.bf16.mxu0 %v959_v0 }
  0x25   :  { %796 = vmatpush3.bf16.msra.mxu1 %v896_v10  ;;  %v927_v10 = vld [vmem:[#allocation2 + $0x118] sm:$0xff]  }
  0x26   :  { %797 = vmatprep.subr.bf16.mxu1 %v959_v0  ;;  %814 = vmatpush3.bf16.msra.mxu0 %v903_v17 }
  0x27   :  { %815 = vmatprep.subr.bf16.mxu0 %v959_v0 }
  0x29   :  { %798 = vmatpush3.bf16.msra.mxu1 %v897_v11  ;;  %v928_v11 = vld [vmem:[#allocation2 + $0x120] sm:$0xff]  }
  0x2a   :  { %799 = vmatprep.subr.bf16.mxu1 %v959_v0  ;;  %816 = vmatpush3.bf16.msra.mxu0 %v904_v18 }
  0x2b   :  { %817 = vmatprep.subr.bf16.mxu0 %v959_v0 }
  0x2d   :  { %800 = vmatpush3.bf16.msra.mxu1 %v898_v12  ;;  %v698_v12 = vld [vmem:[%s1098_s3 + $0x3] ss:$0 sm:$0xff] }
  0x2e   :  { %801 = vmatprep.subr.bf16.mxu1 %v959_v0  ;;  %818 = vmatpush3.bf16.msra.mxu0 %v905_v19 }
  0x2f   :  { %819 = vmatprep.subr.bf16.mxu0 %v959_v0 }
  0x31   :  { %802 = vmatpush3.bf16.msra.mxu1 %v899_v13 }
  0x32   :  { %827 = vmatprep.subr.bf16.mxu1 %v959_v0  ;;  %820 = vmatpush3.bf16.msra.mxu0 %v906_v30 }
  0x33   :  { %821 = vmatprep.subr.bf16.mxu0 %v959_v0 }
  0x36   :  { %822 = vmatpush3.bf16.msra.mxu0 %v907_v31 }
  0x37   :  { %847 = vmatprep.subr.bf16.mxu0 %v959_v0 }
  0xeb   :  { %v83_v21 = vpop.f32.mrb[0].mxu0 }
  0xec   :  { %v1033_v22 = vadd.f32 %v678_v20, %v83_v21  ;;  %v785_v23 = vpop.f32.mrb[1].mxu0 }
  0xed   :  { %v86_v24 = vpop.f32.mrb[2].mxu0  ;;  %v930_v23 = vld [vmem:[#allocation2 + $0x130] sm:$0xff]  }
  0xee   :  { %v1035_v25 = vadd.f32 %v678_v20, %v86_v24  ;;  %v786_v26 = vpop.f32.mrb[3].mxu0  ;;  %v90_v27 = vmax.f32 %v1033_v22, 0.0  ;;  %v929_v22 = vld [vmem:[#allocation2 + $0x128] sm:$0xff]   ;;  %v931_v24 = vld [vmem:[#allocation2 + $0x138] sm:$0xff]  }
  0xf0   :  { %v91_v28 = vmax.f32 %v1035_v25, 0.0  ;;  %v707_v25 = vld [vmem:[%s1098_s3 + $0x4] ss:$0 sm:$0xff] }
  0xf2   :  { %v92_v29 = vpack.c.bf16 %v91_v28, %v90_v27 }
  0xf4   :  { %804 = vmatmul.mubr.bf16.vlgmr.msra.gmra.mrb[0].mxu1 %v92_v29 }
  0xf5   :  { %843 = vmatprep.mubr.msk.bf16.mxu1 %vm960_vm0, %v959_v0  ;;  %828 = vmatpush3.bf16.msra.mxu1 %v908_v32 }
  0xf6   :  { %829 = vmatprep.subr.bf16.mxu1 %v959_v0 }
  0xf9   :  { %830 = vmatpush3.bf16.msra.mxu1 %v909_v33 }
  0xfa   :  { %831 = vmatprep.subr.bf16.mxu1 %v959_v0 }
  0xfd   :  { %832 = vmatpush3.bf16.msra.mxu1 %v910_v34 }
  0xfe   :  { %833 = vmatprep.subr.bf16.mxu1 %v959_v0 }
 0x101   :  { %834 = vmatpush3.bf16.msra.mxu1 %v911_v35 }
 0x102   :  { %835 = vmatprep.subr.bf16.mxu1 %v959_v0 }
 0x105   :  { %836 = vmatpush3.bf16.msra.mxu1 %v912_v36 }
 0x106   :  { %837 = vmatprep.subr.bf16.mxu1 %v959_v0 }
 0x109   :  { %838 = vmatpush3.bf16.msra.mxu1 %v913_v47 }
 0x10a   :  { %839 = vmatprep.subr.bf16.mxu1 %v959_v0 }
 0x10d   :  { %840 = vmatpush3.bf16.msra.mxu1 %v914_v48 }
 0x10e   :  { %841 = vmatprep.subr.bf16.mxu1 %v959_v0 }
 0x111   :  { %842 = vmatpush3.bf16.msra.mxu1 %v915_v49 }
 0x112   :  { %867 = vmatprep.subr.bf16.mxu1 %v959_v0 }
 0x1c7   :  { %v196_v38 = vpop.f32.mrb[0].mxu1 }
 0x1c8   :  { %v197_v39 = vadd.f32 %v680_v37, %v196_v38  ;;  %v805_v40 = vpop.f32.mrb[1].mxu1 }
 0x1c9   :  { %v199_v41 = vpop.f32.mrb[2].mxu1 }
 0x1ca   :  { %v200_v42 = vadd.f32 %v680_v37, %v199_v41  ;;  %v806_v43 = vpop.f32.mrb[3].mxu1  ;;  %v203_v44 = vmax.f32 %v197_v39, 0.0 }
 0x1cc   :  { %v204_v45 = vmax.f32 %v200_v42, 0.0 }
 0x1ce   :  { %v205_v46 = vpack.c.bf16 %v204_v45, %v203_v44 }
 0x1d0   :  { %824 = vmatmul.mubr.bf16.vlgmr.msra.gmra.mrb[4].mxu0 %v205_v46 }
 0x1d1   :  { %863 = vmatprep.mubr.msk.bf16.mxu0 %vm960_vm0, %v959_v0  ;;  %848 = vmatpush3.bf16.msra.mxu0 %v916_v50 }
 0x1d2   :  { %849 = vmatprep.subr.bf16.mxu0 %v959_v0 }
 0x1d5   :  { %850 = vmatpush3.bf16.msra.mxu0 %v917_v51 }
 0x1d6   :  { %851 = vmatprep.subr.bf16.mxu0 %v959_v0 }
 0x1d9   :  { %852 = vmatpush3.bf16.msra.mxu0 %v918_v52 }
 0x1da   :  { %853 = vmatprep.subr.bf16.mxu0 %v959_v0 }
 0x1dd   :  { %854 = vmatpush3.bf16.msra.mxu0 %v919_v53 }
 0x1de   :  { %855 = vmatprep.subr.bf16.mxu0 %v959_v0 }
 0x1e1   :  { %856 = vmatpush3.bf16.msra.mxu0 %v920_v54 }
 0x1e2   :  { %857 = vmatprep.subr.bf16.mxu0 %v959_v0 }
 0x1e5   :  { %858 = vmatpush3.bf16.msra.mxu0 %v921_v55 }
 0x1e6   :  { %859 = vmatprep.subr.bf16.mxu0 %v959_v0 }
 0x1e9   :  { %860 = vmatpush3.bf16.msra.mxu0 %v922_v5 }
 0x1ea   :  { %861 = vmatprep.subr.bf16.mxu0 %v959_v0 }
 0x1ed   :  { %862 = vmatpush3.bf16.msra.mxu0 %v923_v6 }
 0x2a3   :  { %v310_v57 = vpop.f32.mrb[4].mxu0 }
 0x2a4   :  { %v311_v58 = vadd.f32 %v689_v56, %v310_v57  ;;  %v825_v59 = vpop.f32.mrb[5].mxu0 }
 0x2a5   :  { %v313_v60 = vpop.f32.mrb[6].mxu0 }
 0x2a6   :  { %v317_v61 = vadd.f32 %v311_v58, %v90_v27  ;;  %v314_v62 = vadd.f32 %v689_v56, %v313_v60  ;;  %v826_v63 = vpop.f32.mrb[7].mxu0 }
 0x2a8   :  { %v318_v1 = vadd.f32 %v314_v62, %v91_v28  ;;  %v319_v2 = vmax.f32 %v317_v61, 0.0 }
 0x2aa   :  { %v320_v3 = vmax.f32 %v318_v1, 0.0 }
 0x2ac   :  { %v321_v4 = vpack.c.bf16 %v320_v3, %v319_v2 }
 0x2ae   :  { %844 = vmatmul.mubr.bf16.vlgmr.msra.gmra.mrb[4].mxu1 %v321_v4 }
 0x2af   :  { %883 = vmatprep.mubr.msk.bf16.mxu1 %vm960_vm0, %v959_v0  ;;  %868 = vmatpush3.bf16.msra.mxu1 %v924_v7 }
 0x2b0   :  { %869 = vmatprep.subr.bf16.mxu1 %v959_v0 }
 0x2b3   :  { %870 = vmatpush3.bf16.msra.mxu1 %v925_v8 }
 0x2b4   :  { %871 = vmatprep.subr.bf16.mxu1 %v959_v0 }
 0x2b7   :  { %872 = vmatpush3.bf16.msra.mxu1 %v926_v9 }
 0x2b8   :  { %873 = vmatprep.subr.bf16.mxu1 %v959_v0 }
 0x2bb   :  { %874 = vmatpush3.bf16.msra.mxu1 %v927_v10 }
 0x2bc   :  { %875 = vmatprep.subr.bf16.mxu1 %v959_v0 }
 0x2bf   :  { %876 = vmatpush3.bf16.msra.mxu1 %v928_v11 }
 0x2c0   :  { %877 = vmatprep.subr.bf16.mxu1 %v959_v0 }
 0x2c3   :  { %878 = vmatpush3.bf16.msra.mxu1 %v929_v22 }
 0x2c4   :  { %879 = vmatprep.subr.bf16.mxu1 %v959_v0 }
 0x2c7   :  { %880 = vmatpush3.bf16.msra.mxu1 %v930_v23 }
 0x2c8   :  { %881 = vmatprep.subr.bf16.mxu1 %v959_v0  ;;  %v716_v0 = vld [vmem:[%s1098_s3 + $0x5] ss:$0 sm:$0xff] }
 0x2cb   :  { %882 = vmatpush3.bf16.msra.mxu1 %v931_v24 }
 0x381   :  { %v426_v13 = vpop.f32.mrb[4].mxu1 }
 0x382   :  { %v427_v14 = vadd.f32 %v698_v12, %v426_v13  ;;  %v845_v15 = vpop.f32.mrb[5].mxu1 }
 0x383   :  { %v429_v16 = vpop.f32.mrb[6].mxu1 }
 0x384   :  { %v430_v17 = vadd.f32 %v698_v12, %v429_v16  ;;  %v846_v18 = vpop.f32.mrb[7].mxu1  ;;  %v433_v19 = vmax.f32 %v427_v14, 0.0 }
 0x386   :  { %v434_v20 = vmax.f32 %v430_v17, 0.0 }
 0x388   :  { %v435_v21 = vpack.c.bf16 %v434_v20, %v433_v19 }
 0x38a   :  { %864 = vmatmul.mubr.bf16.vlgmr.msra.gmra.mrb[8].mxu0 %v435_v21 }
 0x45d   :  { %v540_v26 = vpop.f32.mrb[8].mxu0 }
 0x45e   :  { %v541_v27 = vadd.f32 %v707_v25, %v540_v26  ;;  %v865_v28 = vpop.f32.mrb[9].mxu0 }
 0x45f   :  { %v543_v29 = vpop.f32.mrb[10].mxu0 }
 0x460   :  { %v547_v30 = vadd.f32 %v541_v27, %v319_v2  ;;  %v544_v31 = vadd.f32 %v707_v25, %v543_v29  ;;  %v866_v32 = vpop.f32.mrb[11].mxu0 }
 0x462   :  { %v548_v33 = vadd.f32 %v544_v31, %v320_v3  ;;  %v549_v34 = vmax.f32 %v547_v30, 0.0 }
 0x464   :  { %v550_v35 = vmax.f32 %v548_v33, 0.0 }
 0x466   :  { %v551_v36 = vpack.c.bf16 %v550_v35, %v549_v34 }
 0x468   :  { %884 = vmatmul.mubr.bf16.vlgmr.msra.gmra.mrb[8].mxu1 %v551_v36 }
 0x53b   :  { %v656_v37 = vpop.f32.mrb[8].mxu1 }
 0x53c   :  { %v885_v38 = vpop.f32.mrb[9].mxu1  ;;  %v657_v40 = vadd.f32 %v716_v0, %v656_v37 }
 0x53d   :  { %v659_v39 = vpop.f32.mrb[10].mxu1 }
 0x53e   :  { %v660_v41 = vadd.f32 %v716_v0, %v659_v39  ;;  %v886_v42 = vpop.f32.mrb[11].mxu1 }
 0x540   :  { %v732_v43 = vpack.c.bf16 %v660_v41, %v657_v40 }
 0x542   :  { %733 = vst [vmem:[%s1099_s4] sm:$0xff] %v732_v43  }
 0x543   :  { %677 = vsyncpa [#allocation3], 1 }

</bundles_post_ra>
